<compile_context>
chip_gen: v5e
topology: v5e:2x2
jax: 0.10.0
libtpu: 0.0.40
codegen_flags: <defaults>
</compile_context>

<pallas_src>
import jax
import jax.numpy as jnp
from jax.experimental import pallas as pl
from jax.experimental.pallas import tpu as pltpu


_VMEM_LIMIT_BYTES = 48 * 1024 * 1024   # explicit; leaves headroom on v7x (64 MiB/TC)
_BLOCK_BUDGET_BYTES = 2 * 1024 * 1024  # ~2 MiB per (tile_r, H*W) block -> ~85% of HBM roofline


def _pick_row_tile(R, L, itemsize, budget_bytes=_BLOCK_BUDGET_BYTES):
    """Pick a row tile that is a multiple of 8 (sublane) and fits the VMEM budget.

    The last block dim is always the full H*W extent (lane-dense, no (…,128)
    constraint issues); partial trailing row blocks are handled via pl.cdiv
    (all kernels here are row-independent, so boundary padding is safe).
    """
    if R <= 8:
        return R                                   # full second-to-last dim is always legal
    rows_in_budget = max(8, (budget_bytes // max(1, L * itemsize)) // 8 * 8)
    return int(min(rows_in_budget, (R // 8) * 8))


# ----------------------------------------------------------------------------
# Kernel 1 (init path only): per-row moments of (x + shift).
# Called twice by the data-dependent initialization:
#   pass 1: shift = 0      -> per-row sums        -> per-channel mean
#   pass 2: shift = -mean  -> centered sum/sumsq  -> per-channel variance
# (two-pass avoids the catastrophic-cancellation sumsq - n*mean^2 formula)
# ----------------------------------------------------------------------------
def _row_moments_kernel(x_ref, shift_ref, sum_ref, sumsq_ref):
    x = x_ref[...].astype(jnp.float32) + shift_ref[...]   # (tile_r, L)
    sum_ref[...] = jnp.sum(x, axis=1, keepdims=True)       # (tile_r, 1)
    sumsq_ref[...] = jnp.sum(x * x, axis=1, keepdims=True)


def _row_moments(x2d, shift_col):
    """x2d: (R, L); shift_col: (R, 1) f32 -> per-row (sum, sumsq), each (R, 1) f32."""
    R, L = x2d.shape
    tile_r = _pick_row_tile(R, L, x2d.dtype.itemsize)
    grid = (pl.cdiv(R, tile_r),)
    return pl.pallas_call(
        _row_moments_kernel,
        out_shape=(
            jax.ShapeDtypeStruct((R, 1), jnp.float32),
            jax.ShapeDtypeStruct((R, 1), jnp.float32),
        ),
        grid=grid,
        in_specs=[
            pl.BlockSpec((tile_r, L), lambda i: (i, 0)),
            pl.BlockSpec((tile_r, 1), lambda i: (i, 0)),
        ],
        out_specs=(
            pl.BlockSpec((tile_r, 1), lambda i: (i, 0)),
            pl.BlockSpec((tile_r, 1), lambda i: (i, 0)),
        ),
        compiler_params=pltpu.CompilerParams(
            dimension_semantics=("parallel",),
            vmem_limit_bytes=_VMEM_LIMIT_BYTES,
        ),
    )(x2d, shift_col)


# ----------------------------------------------------------------------------
# Kernel 2 (hot path):  out = scale * (x + loc), per-row loc/scale columns.
# ----------------------------------------------------------------------------
def _actnorm_kernel(x_ref, loc_ref, scale_ref, out_ref):
    x = x_ref[...].astype(jnp.float32)       # (tile_r, L)
    loc = loc_ref[...]                       # (tile_r, 1) f32, lane-broadcast
    scale = scale_ref[...]                   # (tile_r, 1) f32
    out_ref[...] = (scale * (x + loc)).astype(out_ref.dtype)


def _per_row_column(param, N, C):
    """(1, C, 1, 1) param -> (N*C, 1) f32 column matching the (N*C, H*W) rows."""
    return jnp.tile(param.reshape(1, C).astype(jnp.float32), (N, 1)).reshape(N * C, 1)


def actnorm_forward(x, loc, scale):
    """x: (N, C, H, W); loc, scale: (1, C, 1, 1). Returns (out NCHW, logdet scalar)."""
    N, C, H, W = x.shape
    R, L = N * C, H * W
    x2 = x.reshape(R, L)                                 # pure view, no transpose
    loc_col = _per_row_column(loc, N, C)                 # (R, 1), a few KB
    scale_col = _per_row_column(scale, N, C)

    tile_r = _pick_row_tile(R, L, x.dtype.itemsize)
    grid = (pl.cdiv(R, tile_r),)

    out2 = pl.pallas_call(
        _actnorm_kernel,
        out_shape=jax.ShapeDtypeStruct((R, L), x.dtype),
        grid=grid,
        in_specs=[
            pl.BlockSpec((tile_r, L), lambda i: (i, 0)),
            pl.BlockSpec((tile_r, 1), lambda i: (i, 0)),
            pl.BlockSpec((tile_r, 1), lambda i: (i, 0)),
        ],
        out_specs=pl.BlockSpec((tile_r, L), lambda i: (i, 0)),
        compiler_params=pltpu.CompilerParams(
            dimension_semantics=("parallel",),           # row blocks are independent
            vmem_limit_bytes=_VMEM_LIMIT_BYTES,
        ),
    )(x2, loc_col, scale_col)

    out = out2.reshape(N, C, H, W)
    # Param-only reduction over C elements: keep it out of the hot kernel.
    logdet = (H * W) * jnp.sum(jnp.log(jnp.abs(scale.astype(jnp.float32))))
    return out, logdet


# ----------------------------------------------------------------------------
# Module-like wrapper reproducing ActNorm.forward semantics.
# ----------------------------------------------------------------------------
class ActNorm:
    def __init__(self, in_channel, logdet=True):
        # Same shapes as the PyTorch nn.Parameters (deterministic init).
        self.loc = jnp.zeros((1, in_channel, 1, 1), jnp.float32)
        self.scale = jnp.ones((1, in_channel, 1, 1), jnp.float32)
        self.initialized = False
        self.logdet = logdet
        self.in_channel = in_channel

    def initialize(self, x):
        # Data-dependent init (first forward call), matching torch:
        #   loc = -mean_per_channel, scale = 1 / (std_per_channel + 1e-6)
        # std is the unbiased (ddof=1) std, as torch.std default.
        # Two-pass (mean, then centered second moment) for numerical stability.
        N, C, H, W = x.shape
        R = N * C
        n_el = N * H * W
        x2 = x.reshape(R, H * W)

        # Pass 1: per-channel mean.
        row_sum, _ = _row_moments(x2, jnp.zeros((R, 1), jnp.float32))
        mean = row_sum.reshape(N, C).sum(axis=0) / n_el                  # (C,)

        # Pass 2: centered moments -> unbiased variance.
        mean_col = jnp.tile(mean.reshape(1, C), (N, 1)).reshape(R, 1)
        row_sum_c, row_sumsq_c = _row_moments(x2, -mean_col)
        sum_c = row_sum_c.reshape(N, C).sum(axis=0)                      # ~0
        sumsq_c = row_sumsq_c.reshape(N, C).sum(axis=0)
        var = (sumsq_c - sum_c * sum_c / n_el) / (n_el - 1)
        std = jnp.sqrt(jnp.maximum(var, 0.0))

        self.loc = (-mean).reshape(1, C, 1, 1)
        self.scale = (1.0 / (std + 1e-6)).reshape(1, C, 1, 1)

    def __call__(self, x):
        if not self.initialized:
            self.initialize(x)
            self.initialized = True
        out, logdet = actnorm_forward(x, self.loc, self.scale)
        if self.logdet:
            return out, logdet
        return out

    def reverse(self, output):
        # TODO(synk): inverse path kept in plain JAX (not part of forward()).
        return output / self.scale - self.loc


if __name__ == "__main__":
    key = jax.random.PRNGKey(0)
    N, C, H, W = 2, 4, 16, 16
    x = jax.random.normal(key, (N, C, H, W), dtype=jnp.float32) * 2.0 + 0.5

    layer = ActNorm(C, logdet=True)
    out, logdet = layer(x)
    out = jax.block_until_ready(out)
    logdet = jax.block_until_ready(logdet)

    # Pure-JAX reference reproducing the PyTorch forward (including data init).
    flat = jnp.transpose(x, (1, 0, 2, 3)).reshape(C, -1)
    mean_ref = flat.mean(axis=1)
    std_ref = jnp.std(flat, axis=1, ddof=1)
    loc_ref = (-mean_ref).reshape(1, C, 1, 1)
    scale_ref = (1.0 / (std_ref + 1e-6)).reshape(1, C, 1, 1)
    out_ref = scale_ref * (x + loc_ref)
    logdet_ref = H * W * jnp.sum(jnp.log(jnp.abs(scale_ref)))

    assert out.shape == (N, C, H, W) and out.dtype == x.dtype
    assert jnp.allclose(out, out_ref, atol=1e-4, rtol=1e-4), "output mismatch"
    assert jnp.allclose(logdet, logdet_ref, atol=1e-3, rtol=1e-4), "logdet mismatch"

    print("KERNEL_OK")
</pallas_src>

<mosaic_0001>
module attributes {stable_mosaic.version = 11 : i64} {
  func.func @_row_moments_kernel(%arg0: i32, %arg1: memref<8x256xf32, #tpu.memory_space<vmem>>, %arg2: memref<8x1xf32, #tpu.memory_space<vmem>>, %arg3: memref<8x1xf32, #tpu.memory_space<vmem>>, %arg4: memref<8x1xf32, #tpu.memory_space<vmem>>) attributes {dimension_semantics = [#tpu.dimension_semantics<parallel>], iteration_bounds = array<i64: 1>, scalar_prefetch = 0 : i64, scratch_operands = 0 : i64, tpu.core_type = #tpu.core_type<tc>, window_params = [{transform_indices = @transform_0, window_bounds = array<i64: 8, 256>}, {transform_indices = @transform_1, window_bounds = array<i64: 8, 1>}, {transform_indices = @transform_2, window_bounds = array<i64: 8, 1>}, {transform_indices = @transform_3, window_bounds = array<i64: 8, 1>}]} {
    %c0 = arith.constant 0 : index
    %c0_0 = arith.constant 0 : index
    %0 = vector.load %arg1[%c0, %c0_0] : memref<8x256xf32, #tpu.memory_space<vmem>>, vector<8x256xf32>
    %c0_1 = arith.constant 0 : index
    %c0_2 = arith.constant 0 : index
    %1 = vector.load %arg2[%c0_1, %c0_2] : memref<8x1xf32, #tpu.memory_space<vmem>>, vector<8x1xf32>
    %2 = vector.broadcast %1 : vector<8x1xf32> to vector<8x256xf32>
    %3 = arith.addf %0, %2 : vector<8x256xf32>
    %cst = arith.constant dense<0.000000e+00> : vector<8xf32>
    %4 = vector.multi_reduction <add>, %3, %cst [1] : vector<8x256xf32> to vector<8xf32>
    %5 = vector.shape_cast %4 : vector<8xf32> to vector<8x1xf32>
    %c0_3 = arith.constant 0 : index
    %c0_4 = arith.constant 0 : index
    %6 = vector.load %arg3[%c0_3, %c0_4] : memref<8x1xf32, #tpu.memory_space<vmem>>, vector<8x1xf32>
    tpu.vector_store %arg3[%c0_3, %c0_4], %5 {strides = array<i32>} : memref<8x1xf32, #tpu.memory_space<vmem>>, vector<8x1xf32>,
    %7 = arith.mulf %3, %3 : vector<8x256xf32>
    %cst_5 = arith.constant dense<0.000000e+00> : vector<8xf32>
    %8 = vector.multi_reduction <add>, %7, %cst_5 [1] : vector<8x256xf32> to vector<8xf32>
    %9 = vector.shape_cast %8 : vector<8xf32> to vector<8x1xf32>
    %c0_6 = arith.constant 0 : index
    %c0_7 = arith.constant 0 : index
    %10 = vector.load %arg4[%c0_6, %c0_7] : memref<8x1xf32, #tpu.memory_space<vmem>>, vector<8x1xf32>
    tpu.vector_store %arg4[%c0_6, %c0_7], %9 {strides = array<i32>} : memref<8x1xf32, #tpu.memory_space<vmem>>, vector<8x1xf32>,
    return
  }
  func.func @transform_0(%arg0: i32) -> (i32, i32) {
    %c0_i32 = arith.constant 0 : i32
    %c0_i32_0 = arith.constant 0 : i32
    return %arg0, %c0_i32 : i32, i32
  }
  func.func @transform_1(%arg0: i32) -> (i32, i32) {
    %c0_i32 = arith.constant 0 : i32
    %c0_i32_0 = arith.constant 0 : i32
    return %arg0, %c0_i32 : i32, i32
  }
  func.func @transform_2(%arg0: i32) -> (i32, i32) {
    %c0_i32 = arith.constant 0 : i32
    %c0_i32_0 = arith.constant 0 : i32
    return %arg0, %c0_i32 : i32, i32
  }
  func.func @transform_3(%arg0: i32) -> (i32, i32) {
    %c0_i32 = arith.constant 0 : i32
    %c0_i32_0 = arith.constant 0 : i32
    return %arg0, %c0_i32 : i32, i32
  }
}

</mosaic_0001>

<bundles_post_ra>
// kernel: tpu_custom_call.1
= control target key start
LH: loop header
LB: loop body
LE: loop exit
PB: predicated region body
PF: predicated region fallthrough
CT: control target
= control target key end

     0   :  { %9 = vsyncpa [#allocation3], 0  ;;  %s86_s15 = smov [#allocation2]   ;;  %s120_s0 = inlined_call_operand.hbm [shape: f32[8,256], index: 0, kind: input, shape index: {}]   ;;  %s121_s1 = inlined_call_operand.vmem [shape: f32[8,1], index: 1, kind: input, shape index: {}]   ;;  %s122_s2 = inlined_call_operand.vmem [shape: f32[8,1], index: 2, kind: output, shape index: {0}]   ;;  %s123_s3 = inlined_call_operand.vmem [shape: f32[8,1], index: 3, kind: output, shape index: {1}]  }
   0x1   :  { %s15_s14 = sshll.u32 %s120_s0, 4  ;;  %s17_s16 = sshll.u32 %s86_s15, 4  ;;  %s16_s14 = int_to_ptr.hbm [resolvable:$true] %s15_s14  ;;  %s18_s16 = int_to_ptr.vmem [resolvable:$true] %s17_s16 }
   0x2   :  { %20 = dma.hbm_to_vmem [thread:$0]  %s16_s14, 256, %s18_s16, [#allocation3]  }
   0x3   :  { %84 = dma.done.wait [#allocation3], 256  }
   0x4   :  { %85 = vsyncadd [#allocation3], 4294967040  ;;  %v87_v0 = vmov 0   ;;  %v29_v1 = vld [vmem:[%s121_s1] sm:$0xff]  ;;  %v28_v3 = vld [vmem:[#allocation2 + $0x8] sm:$0xff]  ;;  %vm40_vm0 = vcmask 7168  }
   0x5   :  { %59 = vset.pattern.permute.xlu0 %v87_v0  ;;  %v27_v2 = vld [vmem:[#allocation2] sm:$0xff] }
   0x6   :  { %32 = vperm.xlu0 %59, %v29_v1  }
  0x78   :  { %v33_v4 = vpop.permute.xlu0 %32 }
  0x79   :  { %v35_v5 = vadd.f32 %v33_v4, %v27_v2  ;;  %v36_v6 = vadd.f32 %v33_v4, %v28_v3 }
  0x7b   :  { %v37_v7 = vadd.f32 %v36_v6, %v35_v5  ;;  %v42_v8 = vmul.f32 %v35_v5, %v35_v5  ;;  %v43_v9 = vmul.f32 %v36_v6, %v36_v6 }
  0x7d   :  { %38 = vadd.xlane.f32.xlu0 %v37_v7  ;;  %v44_v10 = vadd.f32 %v43_v9, %v42_v8 }
  0x7f   :  { %45 = vadd.xlane.f32.xlu1 %v44_v10 }
  0xf0   :  { %v39_v11 = vpop.xlane.xlu0 %38 }
  0xf1   :  { %41 = vst.msk [vmem:[%s122_s2] sm:$0xff] %vm40_vm0, %v39_v11 }
  0xf2   :  { %v46_v12 = vpop.xlane.xlu1 %45 }
  0xf3   :  { %47 = vst.msk [vmem:[%s123_s3] sm:$0xff] %vm40_vm0, %v46_v12 }
  0xf4   :  { %56 = vsyncpa [#allocation3], 1 }

</bundles_post_ra>
